<compile_context>
chip_gen: v5e
topology: v5e:2x2
jax: 0.10.0
libtpu: 0.0.40
codegen_flags: <defaults>
</compile_context>

<pallas_src>
import functools

import jax
import jax.numpy as jnp
from jax.experimental import pallas as pl
from jax.experimental.pallas import tpu as pltpu


def _round_up(x: int, m: int) -> int:
    return (x + m - 1) // m * m


def _apply_act(h, act: str):
    if act == "silu":
        return h * jax.nn.sigmoid(h)
    if act == "gelu":
        # GELU tanh approximation (matches nn.GELU(approximate='tanh')).
        c = jnp.float32(0.7978845608028654)  # sqrt(2/pi)
        return 0.5 * h * (1.0 + jnp.tanh(c * (h + 0.044715 * h * h * h)))
    raise ValueError(f"unsupported act_func {act}")


# ----------------------------------------------------------------------------- kernels
def _mlp_kernel_resident(x_ref, w1_ref, b1_ref, w2_ref, b2_ref, o_ref, *, act):
    """Single hidden tile: full weights resident in VMEM, no reduction axis."""
    h = jnp.dot(x_ref[...], w1_ref[...], preferred_element_type=jnp.float32)
    h = _apply_act(h + b1_ref[...], act)
    y = jnp.dot(h.astype(w2_ref.dtype), w2_ref[...],
                preferred_element_type=jnp.float32)
    o_ref[...] = (y + b2_ref[...]).astype(o_ref.dtype)


def _mlp_kernel_accum(x_ref, w1_ref, b1_ref, w2_ref, b2_ref, o_ref, acc_ref, *, act):
    """Hidden dim tiled: accumulate partial second-matmul products in f32 VMEM."""
    h_idx = pl.program_id(1)

    @pl.when(h_idx == 0)
    def _init():
        acc_ref[...] = jnp.zeros_like(acc_ref)

    h = jnp.dot(x_ref[...], w1_ref[...], preferred_element_type=jnp.float32)
    h = _apply_act(h + b1_ref[...], act)
    acc_ref[...] += jnp.dot(h.astype(w2_ref.dtype), w2_ref[...],
                            preferred_element_type=jnp.float32)

    @pl.when(h_idx == pl.num_programs(1) - 1)
    def _finalize():
        o_ref[...] = (acc_ref[...] + b2_ref[...]).astype(o_ref.dtype)


# ----------------------------------------------------------------------------- sizing
def _vmem_capacity_bytes() -> int:
    try:
        return int(pltpu.get_tpu_info().vmem_capacity_bytes)
    except Exception:
        return 64 << 20  # most conservative (v7x per-TensorCore)


def _tile_vmem_bytes(tile_m, tile_h, in_pad, cbytes, obytes, n_h):
    """Estimate of VMEM use: double-buffered I/O + acc scratch + intermediate h."""
    v = 2 * tile_m * in_pad * cbytes                 # x tile
    v += 2 * in_pad * tile_h * cbytes                # W1 tile
    v += 2 * tile_h * in_pad * cbytes                # W2 tile
    v += 2 * 8 * tile_h * 4 + 2 * 8 * in_pad * 4     # biases (sublane-padded f32)
    v += 2 * tile_m * in_pad * obytes                # output tile
    if n_h > 1:
        v += tile_m * in_pad * 4                     # f32 accumulator scratch
    v += tile_m * tile_h * (4 + cbytes)              # materialized activation h
    return v


def prepare_mlp_params(w1, b1, w2, b2, *, compute_dtype=jnp.bfloat16, vmem_budget=None):
    """Pad/cast weights ONCE (call outside the hot loop) and pick the hidden tile."""
    in_dim, hid = w1.shape
    assert w2.shape == (hid, in_dim)
    assert b1.shape == (hid,) and b2.shape == (in_dim,)

    cdt = jnp.dtype(compute_dtype)
    cbytes = cdt.itemsize
    in_pad = _round_up(in_dim, 128)
    hid_pad = _round_up(hid, 128)

    if vmem_budget is None:
        vmem_budget = int(_vmem_capacity_bytes() * 0.8)

    # Hidden tile: prefer fully-resident weights (tile_h == hid_pad). Otherwise
    # the largest divisor of hid_pad (>=256 preferred, never forced down to 128
    # unless nothing else fits) that still leaves room for a 256-token tile.
    sublane = 16 if cbytes == 2 else 8
    tm_ref = max(256, sublane)
    cands = [hid_pad] + [t for t in (2048, 1024, 512, 256, 128)
                         if t < hid_pad and hid_pad % t == 0]
    tile_h = cands[-1]
    for th in cands:
        n_h = hid_pad // th
        if _tile_vmem_bytes(tm_ref, th, in_pad, cbytes, 4, n_h) <= vmem_budget:
            tile_h = th
            break

    def padcast(a, shape):
        pads = [(0, s - d) for d, s in zip(a.shape, shape)]
        return jnp.pad(a, pads).astype(cdt)

    return dict(
        w1=padcast(w1, (in_pad, hid_pad)),
        w2=padcast(w2, (hid_pad, in_pad)),
        b1=jnp.pad(b1, (0, hid_pad - hid)).astype(jnp.float32).reshape(1, hid_pad),
        b2=jnp.pad(b2, (0, in_pad - in_dim)).astype(jnp.float32).reshape(1, in_pad),
        in_dim=in_dim, hid=hid, in_pad=in_pad, hid_pad=hid_pad,
        tile_h=int(tile_h), compute_dtype=cdt, vmem_budget=int(vmem_budget),
    )


# ----------------------------------------------------------------------------- forward
def mlp_forward(x, params, *, act_func="silu", tile_m=None):
    act = act_func.lower()
    if act not in ("silu", "gelu"):
        raise ValueError(f"unsupported act_func {act_func}")

    in_dim = params["in_dim"]
    in_pad, hid_pad, tile_h = params["in_pad"], params["hid_pad"], params["tile_h"]
    cdt = params["compute_dtype"]
    cbytes = cdt.itemsize
    budget = params["vmem_budget"]

    out_dtype = x.dtype
    obytes = jnp.dtype(out_dtype).itemsize
    sublane = 16 if cbytes == 2 else 8

    assert x.shape[-1] == in_dim
    lead = x.shape[:-1]
    x2d = x.reshape(-1, in_dim)
    n_tok = x2d.shape[0]
    n_h = hid_pad // tile_h

    # Token tile: the primary knob. Largest multiple of `sublane` that fits the
    # VMEM budget (capped at 1024 / padded token count) so weight re-fetch
    # amortizes over as many tokens as possible.
    if tile_m is None:
        cap = min(1024, _round_up(max(n_tok, 1), sublane))
        tile_m = sublane
        tm = cap
        while tm >= sublane:
            if _tile_vmem_bytes(tm, tile_h, in_pad, cbytes, obytes, n_h) <= budget:
                tile_m = tm
                break
            tm -= sublane
    tile_m = _round_up(max(int(tile_m), sublane), sublane)

    n_tok_pad = _round_up(max(n_tok, 1), tile_m)
    n_i = n_tok_pad // tile_m

    xp = x2d
    if (n_tok_pad, in_pad) != (n_tok, in_dim):
        xp = jnp.pad(xp, ((0, n_tok_pad - n_tok), (0, in_pad - in_dim)))
    xp = xp.astype(cdt)

    vmem_need = _tile_vmem_bytes(tile_m, tile_h, in_pad, cbytes, obytes, n_h)
    vmem_cap = _vmem_capacity_bytes()
    vmem_limit = int(min(max(vmem_need + (4 << 20), 32 << 20), vmem_cap))

    # Advisory cost estimate so XLA can schedule around the custom call.
    weight_passes = 1 if n_h == 1 else n_i
    cost = pl.CostEstimate(
        flops=4 * n_tok_pad * in_pad * hid_pad,
        transcendentals=n_tok_pad * hid_pad,
        bytes_accessed=(n_tok_pad * in_pad * (cbytes + obytes)
                        + weight_passes * 2 * in_pad * hid_pad * cbytes
                        + (hid_pad + in_pad) * 4),
    )

    w1p, b1p, w2p, b2p = params["w1"], params["b1"], params["w2"], params["b2"]

    if n_h == 1:
        # Fully-resident weights: constant weight block index -> single HBM fetch.
        out2d = pl.pallas_call(
            functools.partial(_mlp_kernel_resident, act=act),
            out_shape=jax.ShapeDtypeStruct((n_tok_pad, in_pad), out_dtype),
            grid=(n_i,),
            in_specs=[
                pl.BlockSpec((tile_m, in_pad), lambda i: (i, 0)),     # x tile
                pl.BlockSpec((in_pad, hid_pad), lambda i: (0, 0)),    # W1 (resident)
                pl.BlockSpec((1, hid_pad), lambda i: (0, 0)),         # b1
                pl.BlockSpec((hid_pad, in_pad), lambda i: (0, 0)),    # W2 (resident)
                pl.BlockSpec((1, in_pad), lambda i: (0, 0)),          # b2
            ],
            out_specs=pl.BlockSpec((tile_m, in_pad), lambda i: (i, 0)),
            compiler_params=pltpu.CompilerParams(
                # Token axis is parallel -> shards across megacore / v7x dual TCs.
                dimension_semantics=("parallel",),
                vmem_limit_bytes=vmem_limit,
            ),
            cost_estimate=cost,
        )(xp, w1p, b1p, w2p, b2p)
    else:
        out2d = pl.pallas_call(
            functools.partial(_mlp_kernel_accum, act=act),
            out_shape=jax.ShapeDtypeStruct((n_tok_pad, in_pad), out_dtype),
            grid=(n_i, n_h),
            in_specs=[
                pl.BlockSpec((tile_m, in_pad), lambda i, h: (i, 0)),  # x tile
                pl.BlockSpec((in_pad, tile_h), lambda i, h: (0, h)),  # W1 hid-tile
                pl.BlockSpec((1, tile_h), lambda i, h: (0, h)),       # b1 hid-tile
                pl.BlockSpec((tile_h, in_pad), lambda i, h: (h, 0)),  # W2 hid-tile
                pl.BlockSpec((1, in_pad), lambda i, h: (0, 0)),       # b2 (full)
            ],
            out_specs=pl.BlockSpec((tile_m, in_pad), lambda i, h: (i, 0)),
            scratch_shapes=[pltpu.VMEM((tile_m, in_pad), jnp.float32)],
            compiler_params=pltpu.CompilerParams(
                dimension_semantics=("parallel", "arbitrary"),
                vmem_limit_bytes=vmem_limit,
            ),
            cost_estimate=cost,
        )(xp, w1p, b1p, w2p, b2p)

    out2d = out2d[:n_tok, :in_dim]
    return out2d.reshape(*lead, in_dim)


def mlp_pallas(x, w1, b1, w2, b2, *, act_func="silu", compute_dtype=jnp.bfloat16,
               tile_m=None, tile_h=None):
    """Convenience wrapper. For production, call prepare_mlp_params once and reuse."""
    params = prepare_mlp_params(w1, b1, w2, b2, compute_dtype=compute_dtype)
    if tile_h is not None:
        assert params["hid_pad"] % tile_h == 0 and tile_h % 128 == 0
        params["tile_h"] = int(tile_h)
    return mlp_forward(x, params, act_func=act_func, tile_m=tile_m)


def mlp_ref(x, w1, b1, w2, b2, act_func="silu"):
    h = x @ w1 + b1
    if act_func == "silu":
        h = h * jax.nn.sigmoid(h)
    else:
        c = jnp.float32(0.7978845608028654)
        h = 0.5 * h * (1.0 + jnp.tanh(c * (h + 0.044715 * h * h * h)))
    return h @ w2 + b2


if __name__ == "__main__":
    # Small shapes consistent with MLP(in_out_dim, hidden_dim).
    batch, seq = 2, 8
    in_out_dim, hidden_dim = 32, 64

    key = jax.random.PRNGKey(0)
    kx, kw1, kb1, kw2, kb2 = jax.random.split(key, 5)

    x = jax.random.normal(kx, (batch, seq, in_out_dim), dtype=jnp.float32)
    # (in, out) layout == transpose of nn.Linear weight.
    w1 = jax.random.normal(kw1, (in_out_dim, hidden_dim), dtype=jnp.float32) * 0.05
    b1 = jax.random.normal(kb1, (hidden_dim,), dtype=jnp.float32) * 0.05
    w2 = jax.random.normal(kw2, (hidden_dim, in_out_dim), dtype=jnp.float32) * 0.05
    b2 = jax.random.normal(kb2, (in_out_dim,), dtype=jnp.float32) * 0.05

    ref_silu = mlp_ref(x, w1, b1, w2, b2, "silu")
    ref_gelu = mlp_ref(x, w1, b1, w2, b2, "gelu")

    # 1) f32 compute, SiLU (resident-weights path), tight tolerance.
    out = jax.block_until_ready(
        mlp_pallas(x, w1, b1, w2, b2, act_func="silu", compute_dtype=jnp.float32))
    assert out.shape == x.shape
    assert jnp.allclose(out, ref_silu, atol=1e-5, rtol=1e-5), "f32 silu mismatch"

    # 2) f32 compute, GELU(tanh).
    out = jax.block_until_ready(
        mlp_pallas(x, w1, b1, w2, b2, act_func="gelu", compute_dtype=jnp.float32))
    assert jnp.allclose(out, ref_gelu, atol=1e-5, rtol=1e-5), "f32 gelu mismatch"

    # 3) bf16 compute (MXU-friendly), loose tolerance vs f32 reference.
    #    NOTE: intermediate activation is cast to bf16 before the second matmul.
    out = jax.block_until_ready(
        mlp_pallas(x, w1, b1, w2, b2, act_func="silu", compute_dtype=jnp.bfloat16))
    assert jnp.allclose(out, ref_silu, atol=5e-2, rtol=5e-2), "bf16 silu mismatch"

    # 4) Exercise the hidden-reduction (accumulator) path: larger hidden dim with a
    #    forced tile_h smaller than hid_pad.
    hidden_big = 256
    kw1b, kb1b, kw2b, kb2b = jax.random.split(jax.random.PRNGKey(1), 4)
    w1b = jax.random.normal(kw1b, (in_out_dim, hidden_big), dtype=jnp.float32) * 0.05
    b1b = jax.random.normal(kb1b, (hidden_big,), dtype=jnp.float32) * 0.05
    w2b = jax.random.normal(kw2b, (hidden_big, in_out_dim), dtype=jnp.float32) * 0.05
    b2b = jax.random.normal(kb2b, (in_out_dim,), dtype=jnp.float32) * 0.05
    ref_b = mlp_ref(x, w1b, b1b, w2b, b2b, "silu")
    out_b = jax.block_until_ready(
        mlp_pallas(x, w1b, b1b, w2b, b2b, act_func="silu",
                   compute_dtype=jnp.float32, tile_h=128))
    assert jnp.allclose(out_b, ref_b, atol=1e-5, rtol=1e-5), "accum-path mismatch"

    print("KERNEL_OK")
</pallas_src>

<mosaic_0001>
module attributes {stable_mosaic.version = 11 : i64} {
  func.func @_mlp_kernel_resident(%arg0: i32, %arg1: memref<16x128xf32, #tpu.memory_space<vmem>>, %arg2: memref<128x128xf32, #tpu.memory_space<vmem>>, %arg3: memref<1x128xf32, #tpu.memory_space<vmem>>, %arg4: memref<128x128xf32, #tpu.memory_space<vmem>>, %arg5: memref<1x128xf32, #tpu.memory_space<vmem>>, %arg6: memref<16x128xf32, #tpu.memory_space<vmem>>) attributes {dimension_semantics = [#tpu.dimension_semantics<parallel>], iteration_bounds = array<i64: 1>, scalar_prefetch = 0 : i64, scratch_operands = 0 : i64, tpu.core_type = #tpu.core_type<tc>, window_params = [{transform_indices = @transform_0, window_bounds = array<i64: 16, 128>}, {pipeline_mode = #tpu.pipeline_mode<synchronous>, transform_indices = @transform_1, window_bounds = array<i64: 128, 128>}, {pipeline_mode = #tpu.pipeline_mode<synchronous>, transform_indices = @transform_2, window_bounds = array<i64: 1, 128>}, {pipeline_mode = #tpu.pipeline_mode<synchronous>, transform_indices = @transform_3, window_bounds = array<i64: 128, 128>}, {pipeline_mode = #tpu.pipeline_mode<synchronous>, transform_indices = @transform_4, window_bounds = array<i64: 1, 128>}, {transform_indices = @transform_5, window_bounds = array<i64: 16, 128>}]} {
    %c0 = arith.constant 0 : index
    %c0_0 = arith.constant 0 : index
    %0 = vector.load %arg1[%c0, %c0_0] : memref<16x128xf32, #tpu.memory_space<vmem>>, vector<16x128xf32>
    %c0_1 = arith.constant 0 : index
    %c0_2 = arith.constant 0 : index
    %1 = vector.load %arg2[%c0_1, %c0_2] : memref<128x128xf32, #tpu.memory_space<vmem>>, vector<128x128xf32>
    %cst = arith.constant dense<0.000000e+00> : vector<16x128xf32>
    %2 = tpu.matmul %0, %1, %cst {dimension_numbers = #tpu.dot_dimension_numbers<[1], [0], [0], [1], [0, 0, 1, 1], [], []>} : vector<16x128xf32>, vector<128x128xf32>, vector<16x128xf32> -> vector<16x128xf32>
    %c0_3 = arith.constant 0 : index
    %c0_4 = arith.constant 0 : index
    %3 = vector.load %arg3[%c0_3, %c0_4] : memref<1x128xf32, #tpu.memory_space<vmem>>, vector<1x128xf32>
    %4 = vector.broadcast %3 : vector<1x128xf32> to vector<16x128xf32>
    %5 = arith.addf %2, %4 : vector<16x128xf32>
    %6 = arith.negf %5 : vector<16x128xf32>
    %7 = math.exp %6 : vector<16x128xf32>
    %cst_5 = arith.constant 1.000000e+00 : f32
    %8 = vector.broadcast %cst_5 : f32 to vector<16x128xf32>
    %9 = arith.addf %8, %7 : vector<16x128xf32>
    %10 = arith.divf %8, %9 : vector<16x128xf32>
    %11 = arith.mulf %5, %10 : vector<16x128xf32>
    %c0_6 = arith.constant 0 : index
    %c0_7 = arith.constant 0 : index
    %12 = vector.load %arg4[%c0_6, %c0_7] : memref<128x128xf32, #tpu.memory_space<vmem>>, vector<128x128xf32>
    %cst_8 = arith.constant dense<0.000000e+00> : vector<16x128xf32>
    %13 = tpu.matmul %11, %12, %cst_8 {dimension_numbers = #tpu.dot_dimension_numbers<[1], [0], [0], [1], [0, 0, 1, 1], [], []>} : vector<16x128xf32>, vector<128x128xf32>, vector<16x128xf32> -> vector<16x128xf32>
    %c0_9 = arith.constant 0 : index
    %c0_10 = arith.constant 0 : index
    %14 = vector.load %arg5[%c0_9, %c0_10] : memref<1x128xf32, #tpu.memory_space<vmem>>, vector<1x128xf32>
    %15 = vector.broadcast %14 : vector<1x128xf32> to vector<16x128xf32>
    %16 = arith.addf %13, %15 : vector<16x128xf32>
    %c0_11 = arith.constant 0 : index
    %c0_12 = arith.constant 0 : index
    %17 = vector.load %arg6[%c0_11, %c0_12] : memref<16x128xf32, #tpu.memory_space<vmem>>, vector<16x128xf32>
    tpu.vector_store %arg6[%c0_11, %c0_12], %16 {strides = array<i32>} : memref<16x128xf32, #tpu.memory_space<vmem>>, vector<16x128xf32>,
    return
  }
  func.func @transform_0(%arg0: i32) -> (i32, i32) {
    %c0_i32 = arith.constant 0 : i32
    %c0_i32_0 = arith.constant 0 : i32
    return %arg0, %c0_i32 : i32, i32
  }
  func.func @transform_1(%arg0: i32) -> (i32, i32) {
    %c0_i32 = arith.constant 0 : i32
    %c0_i32_0 = arith.constant 0 : i32
    %c0_i32_1 = arith.constant 0 : i32
    return %c0_i32, %c0_i32_0 : i32, i32
  }
  func.func @transform_2(%arg0: i32) -> (i32, i32) {
    %c0_i32 = arith.constant 0 : i32
    %c0_i32_0 = arith.constant 0 : i32
    %c0_i32_1 = arith.constant 0 : i32
    return %c0_i32, %c0_i32_0 : i32, i32
  }
  func.func @transform_3(%arg0: i32) -> (i32, i32) {
    %c0_i32 = arith.constant 0 : i32
    %c0_i32_0 = arith.constant 0 : i32
    %c0_i32_1 = arith.constant 0 : i32
    return %c0_i32, %c0_i32_0 : i32, i32
  }
  func.func @transform_4(%arg0: i32) -> (i32, i32) {
    %c0_i32 = arith.constant 0 : i32
    %c0_i32_0 = arith.constant 0 : i32
    %c0_i32_1 = arith.constant 0 : i32
    return %c0_i32, %c0_i32_0 : i32, i32
  }
  func.func @transform_5(%arg0: i32) -> (i32, i32) {
    %c0_i32 = arith.constant 0 : i32
    %c0_i32_0 = arith.constant 0 : i32
    return %arg0, %c0_i32 : i32, i32
  }
}

</mosaic_0001>

<bundles_post_ra>
// kernel: tpu_custom_call.1
= control target key start
LH: loop header
LB: loop body
LE: loop exit
PB: predicated region body
PF: predicated region fallthrough
CT: control target
= control target key end

     0   :  { %10 = vsyncpa [#allocation3], 0  ;;  %s436_s0 = inlined_call_operand.hbm [shape: f32[16,128], index: 0, kind: input, shape index: {}]   ;;  %s437_s1 = inlined_call_operand.hbm [shape: f32[128,128], index: 1, kind: input, shape index: {}]   ;;  %s438_s2 = inlined_call_operand.vmem [shape: f32[1,128], index: 2, kind: input, shape index: {}]   ;;  %s439_s3 = inlined_call_operand.hbm [shape: f32[128,128], index: 3, kind: input, shape index: {}]   ;;  %s440_s4 = inlined_call_operand.vmem [shape: f32[1,128], index: 4, kind: input, shape index: {}]   ;;  %s441_s5 = inlined_call_operand.hbm [shape: f32[16,128], index: 5, kind: output, shape index: {}]  }
   0x1   :  { %11 = vsyncpa [#allocation6], 0 }
   0x2   :  { %12 = vsyncpa [#allocation4], 0  ;;  %s30_s20 = sshll.u32 %s437_s1, 4  ;;  %s370_s21 = smov [#allocation5]   ;;  %s31_s20 = int_to_ptr.hbm [resolvable:$true] %s30_s20 }
   0x3   :  { %s32_s22 = sshll.u32 %s370_s21, 4  ;;  %s17_s25 = sshll.u32 %s436_s0, 4  ;;  %s33_s22 = int_to_ptr.vmem [resolvable:$true] %s32_s22  ;;  %s18_s25 = int_to_ptr.hbm [resolvable:$true] %s17_s25 }
   0x4   :  { %s371_s26 = smov 128   ;;  %s372_s27 = smov 8  }
   0x5   :  { %38 = dma.hbm_to_vmem [thread:$0]  %s31_s20, 2048, %s33_s22, [#allocation6], %s371_s26, %s371_s26, %s372_s27  }
   0x6   :  { %s373_s28 = smov [#allocation2]   ;;  %s45_s1 = sshll.u32 %s439_s3, 4  ;;  %s46_s1 = int_to_ptr.hbm [resolvable:$true] %s45_s1 }
   0x7   :  { %s19_s29 = sshll.u32 %s373_s28, 4  ;;  %s374_s0 = smov [#allocation7]   ;;  %s20_s29 = int_to_ptr.vmem [resolvable:$true] %s19_s29 }
   0x8   :  { %25 = dma.hbm_to_vmem [thread:$0]  %s18_s25, 256, %s20_s29, [#allocation3], %s371_s26, %s371_s26, %s372_s27  }
   0x9   :  { %s47_s7 = sshll.u32 %s374_s0, 4  ;;  %s48_s7 = int_to_ptr.vmem [resolvable:$true] %s47_s7 }
   0xa   :  { %53 = dma.hbm_to_vmem [thread:$0]  %s46_s1, 2048, %s48_s7, [#allocation6], %s371_s26, %s371_s26, %s372_s27  }
   0xb   :  { %364 = dma.done.wait [#allocation3], 256  }
   0xc   :  { %365 = vsyncadd [#allocation3], 4294967040 }
   0xd   :  { %366 = dma.done.wait [#allocation6], 4096  }
   0xe   :  { %367 = vsyncadd [#allocation6], 4294963200  ;;  %v85_v0 = vld [vmem:[#allocation5 + $0x78] sm:$0xff]  ;;  %v84_v1 = vld [vmem:[#allocation5 + $0x70] sm:$0xff]  ;;  %s375_s10 = smov [#allocation8]   ;;  %s204_s14 = sshll.u32 %s441_s5, 4  ;;  %s205_s14 = int_to_ptr.hbm [resolvable:$true] %s204_s14 }
   0xf   :  { %90 = vmatpush.msra.mxu0 %v85_v0  ;;  %220 = vmatpush.msra.mxu2 %v85_v0  ;;  %v83_v2 = vld [vmem:[#allocation5 + $0x68] sm:$0xff]  ;;  %v82_v3 = vld [vmem:[#allocation5 + $0x60] sm:$0xff]  ;;  %v81_v4 = vld [vmem:[#allocation5 + $0x58] sm:$0xff]  ;;  %s202_s11 = sshll.u32 %s375_s10, 4  ;;  %s203_s11 = int_to_ptr.vmem [resolvable:$true] %s202_s11 }
  0x10   :  { %v80_v5 = vld [vmem:[#allocation5 + $0x50] sm:$0xff]  ;;  %v79_v6 = vld [vmem:[#allocation5 + $0x48] sm:$0xff]  ;;  %v78_v7 = vld [vmem:[#allocation5 + $0x40] sm:$0xff] }
  0x11   :  { %91 = vmatpush.msra.mxu0 %v84_v1  ;;  %221 = vmatpush.msra.mxu2 %v84_v1  ;;  %v77_v8 = vld [vmem:[#allocation5 + $0x38] sm:$0xff]  ;;  %v76_v9 = vld [vmem:[#allocation5 + $0x30] sm:$0xff]  ;;  %v75_v10 = vld [vmem:[#allocation5 + $0x28] sm:$0xff] }
  0x12   :  { %v74_v11 = vld [vmem:[#allocation5 + $0x20] sm:$0xff]  ;;  %v73_v12 = vld [vmem:[#allocation5 + $0x18] sm:$0xff]  ;;  %v72_v13 = vld [vmem:[#allocation5 + $0x10] sm:$0xff] }
  0x13   :  { %92 = vmatpush.msra.mxu0 %v83_v2  ;;  %222 = vmatpush.msra.mxu2 %v83_v2  ;;  %v71_v14 = vld [vmem:[#allocation5 + $0x8] sm:$0xff]  ;;  %v70_v15 = vld [vmem:[#allocation5] sm:$0xff]  ;;  %v68_v16 = vld [vmem:[#allocation2] sm:$0xff] }
  0x14   :  { %v69_v17 = vld [vmem:[#allocation2 + $0x8] sm:$0xff]  ;;  %v167_v19 = vld [vmem:[#allocation7 + $0x70] sm:$0xff]  ;;  %v166_v20 = vld [vmem:[#allocation7 + $0x68] sm:$0xff] }
  0x15   :  { %93 = vmatpush.msra.mxu0 %v82_v3  ;;  %223 = vmatpush.msra.mxu2 %v82_v3  ;;  %v168_v18 = vld [vmem:[#allocation7 + $0x78] sm:$0xff]  ;;  %v165_v21 = vld [vmem:[#allocation7 + $0x60] sm:$0xff]  ;;  %v163_v23 = vld [vmem:[#allocation7 + $0x50] sm:$0xff] }
  0x16   :  { %173 = vmatpush.msra.mxu1 %v168_v18  ;;  %236 = vmatpush.msra.mxu3 %v168_v18  ;;  %v164_v22 = vld [vmem:[#allocation7 + $0x58] sm:$0xff]  ;;  %v162_v24 = vld [vmem:[#allocation7 + $0x48] sm:$0xff]  ;;  %v161_v25 = vld [vmem:[#allocation7 + $0x40] sm:$0xff] }
  0x17   :  { %94 = vmatpush.msra.mxu0 %v81_v4  ;;  %224 = vmatpush.msra.mxu2 %v81_v4  ;;  %v160_v26 = vld [vmem:[#allocation7 + $0x38] sm:$0xff]  ;;  %v159_v27 = vld [vmem:[#allocation7 + $0x30] sm:$0xff]  ;;  %v158_v28 = vld [vmem:[#allocation7 + $0x28] sm:$0xff] }
  0x18   :  { %174 = vmatpush.msra.mxu1 %v167_v19  ;;  %237 = vmatpush.msra.mxu3 %v167_v19  ;;  %v157_v29 = vld [vmem:[#allocation7 + $0x20] sm:$0xff]  ;;  %v156_v30 = vld [vmem:[#allocation7 + $0x18] sm:$0xff]  ;;  %v155_v31 = vld [vmem:[#allocation7 + $0x10] sm:$0xff] }
  0x19   :  { %95 = vmatpush.msra.mxu0 %v80_v5  ;;  %225 = vmatpush.msra.mxu2 %v80_v5  ;;  %v154_v32 = vld [vmem:[#allocation7 + $0x8] sm:$0xff]  ;;  %v258_v33 = vld [vmem:[%s438_s2] ss:$0 sm:$0xff]  ;;  %v153_v34 = vld [vmem:[#allocation7] sm:$0xff] }
  0x1a   :  { %175 = vmatpush.msra.mxu1 %v166_v20  ;;  %238 = vmatpush.msra.mxu3 %v166_v20  ;;  %v259_v3 = vld [vmem:[%s440_s4] ss:$0 sm:$0xff] }
  0x1b   :  { %96 = vmatpush.msra.mxu0 %v79_v6  ;;  %226 = vmatpush.msra.mxu2 %v79_v6 }
  0x1c   :  { %176 = vmatpush.msra.mxu1 %v165_v21  ;;  %239 = vmatpush.msra.mxu3 %v165_v21 }
  0x1d   :  { %97 = vmatpush.msra.mxu0 %v78_v7  ;;  %227 = vmatpush.msra.mxu2 %v78_v7 }
  0x1e   :  { %177 = vmatpush.msra.mxu1 %v164_v22  ;;  %240 = vmatpush.msra.mxu3 %v164_v22 }
  0x1f   :  { %98 = vmatpush.msra.mxu0 %v77_v8  ;;  %228 = vmatpush.msra.mxu2 %v77_v8 }
  0x20   :  { %178 = vmatpush.msra.mxu1 %v163_v23  ;;  %241 = vmatpush.msra.mxu3 %v163_v23 }
  0x21   :  { %99 = vmatpush.msra.mxu0 %v76_v9  ;;  %229 = vmatpush.msra.mxu2 %v76_v9 }
  0x22   :  { %179 = vmatpush.msra.mxu1 %v162_v24  ;;  %242 = vmatpush.msra.mxu3 %v162_v24 }
  0x23   :  { %100 = vmatpush.msra.mxu0 %v75_v10  ;;  %230 = vmatpush.msra.mxu2 %v75_v10 }
  0x24   :  { %180 = vmatpush.msra.mxu1 %v161_v25  ;;  %243 = vmatpush.msra.mxu3 %v161_v25 }
  0x25   :  { %101 = vmatpush.msra.mxu0 %v74_v11  ;;  %231 = vmatpush.msra.mxu2 %v74_v11 }
  0x26   :  { %181 = vmatpush.msra.mxu1 %v160_v26  ;;  %244 = vmatpush.msra.mxu3 %v160_v26 }
  0x27   :  { %102 = vmatpush.msra.mxu0 %v73_v12  ;;  %232 = vmatpush.msra.mxu2 %v73_v12 }
  0x28   :  { %182 = vmatpush.msra.mxu1 %v159_v27  ;;  %245 = vmatpush.msra.mxu3 %v159_v27 }
  0x29   :  { %103 = vmatpush.msra.mxu0 %v72_v13  ;;  %233 = vmatpush.msra.mxu2 %v72_v13 }
  0x2a   :  { %183 = vmatpush.msra.mxu1 %v158_v28  ;;  %246 = vmatpush.msra.mxu3 %v158_v28 }
  0x2b   :  { %104 = vmatpush.msra.mxu0 %v71_v14  ;;  %234 = vmatpush.msra.mxu2 %v71_v14 }
  0x2c   :  { %184 = vmatpush.msra.mxu1 %v157_v29  ;;  %247 = vmatpush.msra.mxu3 %v157_v29 }
  0x2d   :  { %105 = vmatpush.msra.mxu0 %v70_v15  ;;  %235 = vmatpush.msra.mxu2 %v70_v15 }
  0x2e   :  { %106 = vmatmul.f32.vlgmr.msra.gmra.mxu0 %v68_v16  ;;  %109 = vmatmul.f32.vlgmr.msra.gmra.mxu2 %v69_v17 }
  0x2f   :  { %185 = vmatpush.msra.mxu1 %v156_v30  ;;  %248 = vmatpush.msra.mxu3 %v156_v30 }
  0x31   :  { %186 = vmatpush.msra.mxu1 %v155_v31  ;;  %249 = vmatpush.msra.mxu3 %v155_v31 }
  0x33   :  { %187 = vmatpush.msra.mxu1 %v154_v32  ;;  %250 = vmatpush.msra.mxu3 %v154_v32 }
  0x35   :  { %188 = vmatpush.msra.mxu1 %v153_v34  ;;  %251 = vmatpush.msra.mxu3 %v153_v34 }
  0xab   :  { %v107_v35 = vpop.f32.mrf.mxu0 }
  0xac   :  { %v108_v36 = vadd.f32 %v258_v33, %v107_v35 }
  0xae   :  { %v218_v37 = vmul.f32 -1.442695, %v108_v36 }
  0xb0   :  { %260 = vpow2.f32 %v218_v37 }
  0xb1   :  { %v110_v38 = vpop.f32.mrf.mxu2 }
  0xb2   :  { %v111_v39 = vadd.f32 %v258_v33, %v110_v38 }
  0xb4   :  { %v219_v40 = vmul.f32 -1.442695, %v111_v39 }
  0xb6   :  { %v261_v41 = vpop.eup %260  ;;  %262 = vpow2.f32 %v219_v40 }
  0xb7   :  { %v119_v42 = vadd.f32 1.0, %v261_v41 }
  0xb9   :  { %264 = vrcp.f32 %v119_v42  ;;  %v132_v47 = vand.u32 2147483648, %v119_v42  ;;  %vm126_vm0 = vweird.f32 %v119_v42  ;;  %v130_v49 = vand.u32 2147483647, %v119_v42 }
  0xbb   :  { %v133_v52 = vor.u32 1.1754944e-38, %v132_v47  ;;  %vm131_vm3 = vcmp.eq.f32.partialorder %v130_v49, 8.507059e+37 }
  0xbc   :  { %v263_v43 = vpop.eup %262 }
  0xbd   :  { %v120_v44 = vadd.f32 1.0, %v263_v43 }
  0xbf   :  { %v265_v45 = vpop.eup %264  ;;  %266 = vrcp.f32 %v120_v44  ;;  %v147_v58 = vand.u32 2147483648, %v120_v44  ;;  %v145_v61 = vand.u32 2147483647, %v120_v44  ;;  %vm141_vm5 = vweird.f32 %v120_v44 }
  0xc0   :  { %v122_v46 = vmul.f32 %v265_v45, %v119_v42  ;;  %vm127_vm1 = vweird.f32 %v265_v45 }
  0xc1   :  { %vm128_vm2 = vmor %vm126_vm0, %vm127_vm1  ;;  %v148_v63 = vor.u32 1.1754944e-38, %v147_v58  ;;  %vm146_vm7 = vcmp.eq.f32.partialorder %v145_v61, 8.507059e+37 }
  0xc2   :  { %v123_v48 = vsub.f32 1.0, %v122_v46 }
  0xc4   :  { %v124_v50 = vmul.f32 %v265_v45, %v123_v48 }
  0xc5   :  { %v267_v51 = vpop.eup %266 }
  0xc6   :  { %v125_v53 = vadd.f32 %v265_v45, %v124_v50  ;;  %v137_v54 = vmul.f32 %v267_v51, %v120_v44  ;;  %vm142_vm4 = vweird.f32 %v267_v51 }
  0xc7   :  { %vm143_vm6 = vmor %vm141_vm5, %vm142_vm4 }
  0xc8   :  { %v129_v55 = vsel %vm128_vm2, %v265_v45, %v125_v53  ;;  %v138_v56 = vsub.f32 1.0, %v137_v54 }
  0xc9   :  { %v134_v57 = vsel %vm131_vm3, %v133_v52, %v129_v55 }
  0xca   :  { %v151_v59 = vmul.f32 %v134_v57, %v108_v36  ;;  %v139_v60 = vmul.f32 %v267_v51, %v138_v56 }
  0xcc   :  { %189 = vmatmul.f32.vlgmr.msra.gmra.mxu1 %v151_v59  ;;  %v140_v62 = vadd.f32 %v267_v51, %v139_v60 }
  0xce   :  { %v144_v0 = vsel %vm143_vm6, %v267_v51, %v140_v62 }
  0xcf   :  { %v149_v1 = vsel %vm146_vm7, %v148_v63, %v144_v0 }
  0xd0   :  { %v152_v2 = vmul.f32 %v149_v1, %v111_v39 }
  0xd2   :  { %192 = vmatmul.f32.vlgmr.msra.gmra.mxu3 %v152_v2 }
 0x149   :  { %v190_v4 = vpop.f32.mrf.mxu1 }
 0x14a   :  { %v191_v5 = vadd.f32 %v259_v3, %v190_v4 }
 0x14c   :  { %196 = vst [vmem:[#allocation8] sm:$0xff] %v191_v5 }
 0x155   :  { %v193_v6 = vpop.f32.mrf.mxu3 }
 0x156   :  { %v194_v7 = vadd.f32 %v259_v3, %v193_v6 }
 0x158   :  { %197 = vst [vmem:[#allocation8 + $0x8] sm:$0xff] %v194_v7 }
 0x159   :  { %210 = dma.vmem_to_hbm [thread:$0]  %s203_s11, 256, %s205_s14, [#allocation4], %s371_s26, %s371_s26, %s372_s27  }
 0x15a   :  { %368 = dma.done.wait [#allocation4], 256  }
 0x15b   :  { %369 = vsyncadd [#allocation4], 4294967040 }
 0x15c   :  { %215 = vsyncpa [#allocation3], 1 }
 0x15d   :  { %216 = vsyncpa [#allocation6], 1 }
 0x15e   :  { %217 = vsyncpa [#allocation4], 1 }

</bundles_post_ra>
